<compile_context>
chip_gen: v7x
topology: tpu7x:2x2x1
jax: 0.10.0
libtpu: 0.0.40
codegen_flags: <defaults>
</compile_context>

<pallas_src>
import functools

import jax
import jax.numpy as jnp
from jax.experimental import pallas as pl
from jax.experimental.pallas import tpu as pltpu

_VMEM_LIMIT_BYTES = 32 * 1024 * 1024  # safe on v5e/v6e (128 MiB) and v7x (64 MiB)


def _round_up(x, m):
    return ((x + m - 1) // m) * m


# ----------------------------------------------------------------------------
# Pallas kernels
# ----------------------------------------------------------------------------
def _matmul_kernel(x_ref, w_ref, b_ref, *rest, relu, has_residual):
    """Tiled matmul with fused bias / residual-add / ReLU epilogue."""
    if has_residual:
        r_ref, o_ref, acc_ref = rest
    else:
        o_ref, acc_ref = rest

    k = pl.program_id(2)

    @pl.when(k == 0)
    def _():
        acc_ref[...] = jnp.zeros_like(acc_ref)

    acc_ref[...] += jnp.dot(
        x_ref[...], w_ref[...], preferred_element_type=jnp.float32
    )

    @pl.when(k == pl.num_programs(2) - 1)
    def _():
        y = acc_ref[...] + b_ref[...].astype(jnp.float32)
        if has_residual:
            y = y + r_ref[...].astype(jnp.float32)
        if relu:
            y = jnp.maximum(y, 0.0)
        o_ref[...] = y.astype(o_ref.dtype)


def _max9_kernel(p_ref, o_ref):
    acc = p_ref[0]
    for i in range(1, 9):
        acc = jnp.maximum(acc, p_ref[i])
    o_ref[...] = acc


def _meanpool_kernel(x_ref, o_ref):
    # x: (tb, H*W, C) -> (tb, C), accumulate in f32
    o_ref[...] = jnp.mean(x_ref[...].astype(jnp.float32), axis=1)


def _l2norm_kernel(x_ref, o_ref):
    x = x_ref[...]
    n = jnp.sqrt(jnp.sum(x * x, axis=1, keepdims=True))
    o_ref[...] = x / jnp.maximum(n, 1e-12)


# ----------------------------------------------------------------------------
# Fused, tiled matmul (bias + optional residual + optional ReLU epilogue)
# ----------------------------------------------------------------------------
@functools.partial(jax.jit, static_argnames=("relu", "out_dtype"))
def fused_matmul(x, w, b, residual=None, *, relu=False, out_dtype=jnp.float32):
    """y = act(x @ w + b [+ residual]); bf16 MXU operands, f32 accumulation."""
    M, K = x.shape
    Kw, N = w.shape
    assert K == Kw

    tm = min(256, _round_up(M, 16))       # mult of 16: safe for bf16 sublanes
    tn = 128                               # MXU-friendly on v5e/v6e/v7x
    tk = min(512, _round_up(K, 128))

    Mp, Kp, Np = _round_up(M, tm), _round_up(K, tk), _round_up(N, tn)

    xb = x.astype(jnp.bfloat16)
    if (Mp, Kp) != (M, K):
        xb = jnp.pad(xb, ((0, Mp - M), (0, Kp - K)))
    wb = w.astype(jnp.bfloat16)
    if (Kp, Np) != (K, N):
        wb = jnp.pad(wb, ((0, Kp - K), (0, Np - N)))
    bb = b.astype(jnp.float32).reshape(1, N)
    if Np != N:
        bb = jnp.pad(bb, ((0, 0), (0, Np - N)))

    args = [xb, wb, bb]
    in_specs = [
        pl.BlockSpec((tm, tk), lambda i, j, k: (i, k)),
        pl.BlockSpec((tk, tn), lambda i, j, k: (k, j)),
        pl.BlockSpec((1, tn), lambda i, j, k: (0, j)),
    ]
    has_residual = residual is not None
    if has_residual:
        rb = residual.astype(jnp.bfloat16)
        if rb.shape != (Mp, Np):
            rb = jnp.pad(rb, ((0, Mp - M), (0, Np - N)))
        args.append(rb)
        in_specs.append(pl.BlockSpec((tm, tn), lambda i, j, k: (i, j)))

    kernel = functools.partial(_matmul_kernel, relu=relu, has_residual=has_residual)

    out = pl.pallas_call(
        kernel,
        out_shape=jax.ShapeDtypeStruct((Mp, Np), out_dtype),
        grid_spec=pltpu.PrefetchScalarGridSpec(
            num_scalar_prefetch=0,
            grid=(Mp // tm, Np // tn, Kp // tk),
            in_specs=in_specs,
            out_specs=pl.BlockSpec((tm, tn), lambda i, j, k: (i, j)),
            scratch_shapes=[pltpu.VMEM((tm, tn), jnp.float32)],
        ),
        compiler_params=pltpu.CompilerParams(
            dimension_semantics=("parallel", "parallel", "arbitrary"),
            vmem_limit_bytes=_VMEM_LIMIT_BYTES,
        ),
    )(*args)

    if (Mp, Np) != (M, N):
        out = out[:M, :N]
    return out


def linear_op(x, lp, relu=False, out_dtype=jnp.float32):
    # lp["w"] is pre-transposed to (in, out), bf16; lp["b"] f32.
    return fused_matmul(x, lp["w"], lp["b"], relu=relu, out_dtype=out_dtype)


# ----------------------------------------------------------------------------
# Conv (im2col + fused matmul), maxpool, global avg-pool, l2-normalize
# ----------------------------------------------------------------------------
def _im2col(x_nhwc, kh, kw, stride, pad):
    n, h, w, c = x_nhwc.shape
    xp = jnp.pad(x_nhwc, ((0, 0), (pad, pad), (pad, pad), (0, 0)))
    ho = (h + 2 * pad - kh) // stride + 1
    wo = (w + 2 * pad - kw) // stride + 1
    cols = []
    for i in range(kh):
        for j in range(kw):
            cols.append(
                xp[:, i:i + stride * (ho - 1) + 1:stride,
                       j:j + stride * (wo - 1) + 1:stride, :]
            )
    patches = jnp.stack(cols, axis=3)  # (N, Ho, Wo, kh*kw, C)
    return patches.reshape(n * ho * wo, kh * kw * c), (n, ho, wo)


@functools.partial(jax.jit, static_argnames=("kh", "kw", "stride", "pad", "relu"))
def _conv_bn_impl(x_nhwc, wm, bias, residual, *, kh, kw, stride, pad, relu):
    x_nhwc = x_nhwc.astype(jnp.bfloat16)
    n, h, w, c = x_nhwc.shape
    if kh == 1 and kw == 1 and pad == 0:
        if stride != 1:
            x_nhwc = x_nhwc[:, ::stride, ::stride, :]
            n, h, w, c = x_nhwc.shape
        cols, ho, wo = x_nhwc.reshape(n * h * w, c), h, w
    else:
        cols, (n, ho, wo) = _im2col(x_nhwc, kh, kw, stride, pad)
    res = None
    if residual is not None:
        res = residual.astype(jnp.bfloat16).reshape(n * ho * wo, -1)
    out = fused_matmul(cols, wm, bias, res, relu=relu, out_dtype=jnp.bfloat16)
    return out.reshape(n, ho, wo, wm.shape[1])


def conv_bn(x_nhwc, cp, stride, pad, relu, residual=None):
    kh, kw = cp["k"]
    return _conv_bn_impl(x_nhwc, cp["w"], cp["b"], residual,
                         kh=kh, kw=kw, stride=stride, pad=pad, relu=relu)


@jax.jit
def maxpool3x3s2(x_nhwc):
    n, h, w, c = x_nhwc.shape
    xp = jnp.pad(x_nhwc, ((0, 0), (1, 1), (1, 1), (0, 0)),
                 constant_values=-jnp.inf)
    ho = (h + 2 - 3) // 2 + 1
    wo = (w + 2 - 3) // 2 + 1
    views = [
        xp[:, i:i + 2 * (ho - 1) + 1:2, j:j + 2 * (wo - 1) + 1:2, :]
        for i in range(3) for j in range(3)
    ]
    stack = jnp.stack(views, axis=0).reshape(9, n * ho * wo, c)
    m = n * ho * wo
    tr = min(512, _round_up(m, 16))
    mp = _round_up(m, tr)
    if mp != m:
        stack = jnp.pad(stack, ((0, 0), (0, mp - m), (0, 0)))
    out = pl.pallas_call(
        _max9_kernel,
        out_shape=jax.ShapeDtypeStruct((mp, c), x_nhwc.dtype),
        grid_spec=pltpu.PrefetchScalarGridSpec(
            num_scalar_prefetch=0,
            grid=(mp // tr,),
            in_specs=[pl.BlockSpec((9, tr, c), lambda i: (0, i, 0))],
            out_specs=pl.BlockSpec((tr, c), lambda i: (i, 0)),
        ),
        compiler_params=pltpu.CompilerParams(
            dimension_semantics=("parallel",),
            vmem_limit_bytes=_VMEM_LIMIT_BYTES,
        ),
    )(stack)
    return out[:m].reshape(n, ho, wo, c)


@jax.jit
def global_avgpool(x_nhwc):
    n, h, w, c = x_nhwc.shape
    xf = x_nhwc.reshape(n, h * w, c)
    npad = _round_up(n, 8)
    if npad != n:
        xf = jnp.pad(xf, ((0, npad - n), (0, 0), (0, 0)))
    out = pl.pallas_call(
        _meanpool_kernel,
        out_shape=jax.ShapeDtypeStruct((npad, c), jnp.float32),
        grid_spec=pltpu.PrefetchScalarGridSpec(
            num_scalar_prefetch=0,
            grid=(npad // 8,),
            in_specs=[pl.BlockSpec((8, h * w, c), lambda i: (i, 0, 0))],
            out_specs=pl.BlockSpec((8, c), lambda i: (i, 0)),
        ),
        compiler_params=pltpu.CompilerParams(
            dimension_semantics=("parallel",),
            vmem_limit_bytes=_VMEM_LIMIT_BYTES,
        ),
    )(xf)
    return out[:n]


@jax.jit
def l2_normalize(x):
    b, d = x.shape
    bp, dp = _round_up(b, 8), _round_up(d, 128)
    xp = x.astype(jnp.float32)
    if (bp, dp) != (b, d):
        xp = jnp.pad(xp, ((0, bp - b), (0, dp - d)))
    out = pl.pallas_call(
        _l2norm_kernel,
        out_shape=jax.ShapeDtypeStruct((bp, dp), jnp.float32),
        grid_spec=pltpu.PrefetchScalarGridSpec(
            num_scalar_prefetch=0,
            grid=(bp // 8,),
            in_specs=[pl.BlockSpec((8, dp), lambda i: (i, 0))],
            out_specs=pl.BlockSpec((8, dp), lambda i: (i, 0)),
        ),
        compiler_params=pltpu.CompilerParams(
            dimension_semantics=("parallel",),
            vmem_limit_bytes=_VMEM_LIMIT_BYTES,
        ),
    )(xp)
    return out[:b, :d]


# ----------------------------------------------------------------------------
# Deterministic parameter init (synthetic weights; shapes match resnet50 + heads)
# ----------------------------------------------------------------------------
def _init_conv(key, o, c, kh, kw):
    return jax.random.normal(key, (o, c, kh, kw), jnp.float32) / jnp.sqrt(
        float(c * kh * kw)
    )


def _init_bn(c):
    return dict(
        gamma=jnp.ones((c,), jnp.float32),
        beta=jnp.zeros((c,), jnp.float32),
        mean=jnp.zeros((c,), jnp.float32),
        var=jnp.ones((c,), jnp.float32),
    )


def _init_linear(key, in_f, out_f):
    w = jax.random.normal(key, (out_f, in_f), jnp.float32) / jnp.sqrt(float(in_f))
    b = jnp.zeros((out_f,), jnp.float32)
    return w, b


def _bottleneck_params(key, inplanes, planes, stride, downsample):
    ks = jax.random.split(key, 4)
    p = {
        "stride": stride,
        "conv1": _init_conv(ks[0], planes, inplanes, 1, 1),
        "bn1": _init_bn(planes),
        "conv2": _init_conv(ks[1], planes, planes, 3, 3),
        "bn2": _init_bn(planes),
        "conv3": _init_conv(ks[2], planes * 4, planes, 1, 1),
        "bn3": _init_bn(planes * 4),
    }
    if downsample:
        p["down_conv"] = _init_conv(ks[3], planes * 4, inplanes, 1, 1)
        p["down_bn"] = _init_bn(planes * 4)
    return p


def init_resnet50(key):
    keys = jax.random.split(key, 5)
    params = {"conv1": _init_conv(keys[0], 64, 3, 7, 7), "bn1": _init_bn(64)}
    cfg = [(64, 3, 1), (128, 4, 2), (256, 6, 2), (512, 3, 2)]
    inplanes = 64
    layers = []
    for li, (planes, nblocks, stride) in enumerate(cfg):
        blocks = []
        for b in range(nblocks):
            s = stride if b == 0 else 1
            ds = b == 0  # resnet50: first block of every stage has a downsample
            bk = jax.random.fold_in(keys[1 + li], b)
            blocks.append(_bottleneck_params(bk, inplanes, planes, s, ds))
            inplanes = planes * 4
        layers.append(blocks)
    params["layers"] = layers
    return params


def init_network(key, num_classes=3):
    ks = jax.random.split(key, 8)
    p = {"resnet": init_resnet50(ks[0]), "num_classes": num_classes}
    p["proj_w"], p["proj_b"] = _init_linear(ks[1], 2048, 128)
    p["connect_w"], p["connect_b"] = _init_linear(ks[2], 1152, 128)
    p["lin_head_w"], p["lin_head_b"] = _init_linear(ks[3], 2048, 128)
    p["mlp1_w"], p["mlp1_b"] = _init_linear(ks[4], 2048, 1024)
    p["mlp2_w"], p["mlp2_b"] = _init_linear(ks[5], 1024, 128)
    p["cls_w"], p["cls_b"] = _init_linear(ks[6], 128, num_classes)
    return p


# ----------------------------------------------------------------------------
# One-time parameter preparation: fold BN into conv weights, pre-transpose,
# cast MXU operands to bf16 (f32 biases).
# ----------------------------------------------------------------------------
def prepare_params(raw, eps=1e-5):
    def fold(conv_w, bn):
        scale = bn["gamma"] / jnp.sqrt(bn["var"] + eps)
        shift = bn["beta"] - bn["mean"] * scale
        o, c, kh, kw = conv_w.shape
        wm = jnp.transpose(conv_w, (2, 3, 1, 0)).reshape(kh * kw * c, o)
        wm = wm * scale[None, :]
        return {"w": wm.astype(jnp.bfloat16),
                "b": shift.astype(jnp.float32),
                "k": (kh, kw)}

    def lin(w_oi, b):
        return {"w": jnp.transpose(w_oi).astype(jnp.bfloat16),
                "b": b.astype(jnp.float32)}

    rn = raw["resnet"]
    prepped = {"stem": fold(rn["conv1"], rn["bn1"])}
    layers = []
    for stage in rn["layers"]:
        blocks = []
        for bp in stage:
            blk = {
                "stride": bp["stride"],
                "c1": fold(bp["conv1"], bp["bn1"]),
                "c2": fold(bp["conv2"], bp["bn2"]),
                "c3": fold(bp["conv3"], bp["bn3"]),
            }
            if "down_conv" in bp:
                blk["down"] = fold(bp["down_conv"], bp["down_bn"])
            blocks.append(blk)
        layers.append(blocks)
    prepped["layers"] = layers

    out = {"resnet": prepped, "num_classes": raw["num_classes"]}
    out["proj"] = lin(raw["proj_w"], raw["proj_b"])
    out["connect"] = lin(raw["connect_w"], raw["connect_b"])
    out["lin_head"] = lin(raw["lin_head_w"], raw["lin_head_b"])
    out["mlp1"] = lin(raw["mlp1_w"], raw["mlp1_b"])
    out["mlp2"] = lin(raw["mlp2_w"], raw["mlp2_b"])
    out["cls"] = lin(raw["cls_w"], raw["cls_b"])
    return out


# ----------------------------------------------------------------------------
# Forward pass
# ----------------------------------------------------------------------------
def _bottleneck(x, p):
    if "down" in p:
        identity = conv_bn(x, p["down"], p["stride"], 0, relu=False)
    else:
        identity = x
    out = conv_bn(x, p["c1"], 1, 0, relu=True)
    out = conv_bn(out, p["c2"], p["stride"], 1, relu=True)
    # conv3 + BN3 + residual add + ReLU fused into one matmul epilogue.
    out = conv_bn(out, p["c3"], 1, 0, relu=True, residual=identity)
    return out


def backbone(x_nchw, rp):
    x = jnp.transpose(x_nchw, (0, 2, 3, 1)).astype(jnp.bfloat16)  # NCHW -> NHWC
    x = conv_bn(x, rp["stem"], 2, 3, relu=True)
    x = maxpool3x3s2(x)
    for stage in rp["layers"]:
        for block in stage:
            x = _bottleneck(x, block)
    return global_avgpool(x)  # (N, 2048) f32


def reduced_image_features(params, images):
    feat = backbone(images, params["resnet"]).reshape(-1, 2048)
    return linear_op(feat, params["proj"])


def network_forward(params, images=None, patches=None, mode=0, head="linear"):
    if mode == 0:
        return reduced_image_features(params, images)
    if mode == 1:
        # Batch all patches (and the image when it has the same shape) through
        # the backbone in a single call instead of 10 sequential passes.
        pstack = jnp.stack(patches, axis=0)              # (P, N, C, H, W)
        P, N = pstack.shape[0], pstack.shape[1]
        pbatch = pstack.reshape((P * N,) + pstack.shape[2:])
        if images.shape[1:] == pbatch.shape[1:]:
            allfeat = reduced_image_features(
                params, jnp.concatenate([images, pbatch], axis=0))
            orig, pfeat = allfeat[:N], allfeat[N:]
        else:
            orig = reduced_image_features(params, images)
            pfeat = reduced_image_features(params, pbatch)
        pfeat = pfeat.reshape(P, N, 128).transpose(1, 0, 2).reshape(N, P * 128)
        pfeat = linear_op(pfeat, params["connect"])
        return orig, pfeat
    if mode == 2:
        enc = backbone(images, params["resnet"]).reshape(-1, 2048)
        if head == "linear":
            feat = l2_normalize(linear_op(enc, params["lin_head"]))
        else:
            feat = linear_op(enc, params["mlp1"], relu=True)   # fused ReLU
            feat = l2_normalize(linear_op(feat, params["mlp2"]))
        return linear_op(feat, params["cls"])
    # TODO(synk): mode 3 (FCN segmentation head) is "not incorporated yet" upstream.
    raise ValueError("unsupported mode")


# ----------------------------------------------------------------------------
if __name__ == "__main__":
    key = jax.random.PRNGKey(0)
    pkey, xkey = jax.random.split(key)
    raw_params = init_network(pkey, num_classes=3)
    params = prepare_params(raw_params)

    # Small input consistent with the module: NCHW, 3 input channels.
    images = jax.random.normal(xkey, (2, 3, 16, 16), jnp.float32)

    feats = network_forward(params, images=images, mode=0)
    feats = jax.block_until_ready(feats)
    assert feats.shape == (2, 128), feats.shape

    logits = network_forward(params, images=images, mode=2)
    logits = jax.block_until_ready(logits)
    assert logits.shape == (2, 3), logits.shape

    print("KERNEL_OK")
</pallas_src>

<mosaic_0001>
module attributes {stable_mosaic.version = 11 : i64} {
  func.func @_matmul_kernel(%arg0: i32, %arg1: i32, %arg2: i32, %arg3: memref<128x256xbf16, #tpu.memory_space<vmem>>, %arg4: memref<256x128xbf16, #tpu.memory_space<vmem>>, %arg5: memref<1x128xf32, #tpu.memory_space<vmem>>, %arg6: memref<128x128xbf16, #tpu.memory_space<vmem>>, %arg7: memref<128x128xf32, #tpu.memory_space<vmem>>) attributes {dimension_semantics = [#tpu.dimension_semantics<parallel>, #tpu.dimension_semantics<parallel>, #tpu.dimension_semantics<arbitrary>], iteration_bounds = array<i64: 1, 1, 1>, scalar_prefetch = 0 : i64, scratch_operands = 1 : i64, tpu.core_type = #tpu.core_type<tc>, window_params = [{transform_indices = @transform_0, window_bounds = array<i64: 128, 256>}, {transform_indices = @transform_1, window_bounds = array<i64: 256, 128>}, {transform_indices = @transform_2, window_bounds = array<i64: 1, 128>}, {transform_indices = @transform_3, window_bounds = array<i64: 128, 128>}]} {
    %c0_i32 = arith.constant 0 : i32
    %0 = arith.cmpi eq, %arg2, %c0_i32 : i32
    %1 = arith.extui %0 : i1 to i32
    %c0_i32_0 = arith.constant 0 : i32
    %2 = arith.cmpi ne, %1, %c0_i32_0 : i32
    scf.if %2 {
      %cst_10 = arith.constant 0.000000e+00 : f32
      %12 = vector.broadcast %cst_10 : f32 to vector<128x128xf32>
      %c0_11 = arith.constant 0 : index
      %c0_12 = arith.constant 0 : index
      %13 = vector.load %arg7[%c0_11, %c0_12] : memref<128x128xf32, #tpu.memory_space<vmem>>, vector<128x128xf32>
      tpu.vector_store %arg7[%c0_11, %c0_12], %12 {strides = array<i32>} : memref<128x128xf32, #tpu.memory_space<vmem>>, vector<128x128xf32>,
    } else {
    }
    %c0 = arith.constant 0 : index
    %c0_1 = arith.constant 0 : index
    %3 = vector.load %arg7[%c0, %c0_1] : memref<128x128xf32, #tpu.memory_space<vmem>>, vector<128x128xf32>
    %c0_2 = arith.constant 0 : index
    %c0_3 = arith.constant 0 : index
    %4 = vector.load %arg3[%c0_2, %c0_3] : memref<128x256xbf16, #tpu.memory_space<vmem>>, vector<128x256xbf16>
    %c0_4 = arith.constant 0 : index
    %c0_5 = arith.constant 0 : index
    %5 = vector.load %arg4[%c0_4, %c0_5] : memref<256x128xbf16, #tpu.memory_space<vmem>>, vector<256x128xbf16>
    %cst = arith.constant dense<0.000000e+00> : vector<128x128xf32>
    %6 = tpu.matmul %4, %5, %cst {dimension_numbers = #tpu.dot_dimension_numbers<[1], [0], [0], [1], [0, 0, 1, 1], [], []>} : vector<128x256xbf16>, vector<256x128xbf16>, vector<128x128xf32> -> vector<128x128xf32>
    %7 = arith.addf %3, %6 : vector<128x128xf32>
    %c0_6 = arith.constant 0 : index
    %c0_7 = arith.constant 0 : index
    %8 = vector.load %arg7[%c0_6, %c0_7] : memref<128x128xf32, #tpu.memory_space<vmem>>, vector<128x128xf32>
    tpu.vector_store %arg7[%c0_6, %c0_7], %7 {strides = array<i32>} : memref<128x128xf32, #tpu.memory_space<vmem>>, vector<128x128xf32>,
    %c0_i32_8 = arith.constant 0 : i32
    %9 = arith.cmpi eq, %arg2, %c0_i32_8 : i32
    %10 = arith.extui %9 : i1 to i32
    %c0_i32_9 = arith.constant 0 : i32
    %11 = arith.cmpi ne, %10, %c0_i32_9 : i32
    scf.if %11 {
      %c0_10 = arith.constant 0 : index
      %c0_11 = arith.constant 0 : index
      %12 = vector.load %arg7[%c0_10, %c0_11] : memref<128x128xf32, #tpu.memory_space<vmem>>, vector<128x128xf32>
      %c0_12 = arith.constant 0 : index
      %c0_13 = arith.constant 0 : index
      %13 = vector.load %arg5[%c0_12, %c0_13] : memref<1x128xf32, #tpu.memory_space<vmem>>, vector<1x128xf32>
      %14 = vector.broadcast %13 : vector<1x128xf32> to vector<128x128xf32>
      %15 = arith.addf %12, %14 : vector<128x128xf32>
      %cst_14 = arith.constant 0.000000e+00 : f32
      %16 = vector.broadcast %cst_14 : f32 to vector<128x128xf32>
      %17 = arith.maximumf %15, %16 : vector<128x128xf32>
      %18 = arith.truncf %17 : vector<128x128xf32> to vector<128x128xbf16>
      %c0_15 = arith.constant 0 : index
      %c0_16 = arith.constant 0 : index
      %19 = vector.load %arg6[%c0_15, %c0_16] : memref<128x128xbf16, #tpu.memory_space<vmem>>, vector<128x128xbf16>
      tpu.vector_store %arg6[%c0_15, %c0_16], %18 {strides = array<i32>} : memref<128x128xbf16, #tpu.memory_space<vmem>>, vector<128x128xbf16>,
    } else {
    }
    return
  }
  func.func @transform_0(%arg0: i32, %arg1: i32, %arg2: i32) -> (i32, i32) {
    %c0_i32 = arith.constant 0 : i32
    return %arg0, %arg2 : i32, i32
  }
  func.func @transform_1(%arg0: i32, %arg1: i32, %arg2: i32) -> (i32, i32) {
    %c0_i32 = arith.constant 0 : i32
    return %arg2, %arg1 : i32, i32
  }
  func.func @transform_2(%arg0: i32, %arg1: i32, %arg2: i32) -> (i32, i32) {
    %c0_i32 = arith.constant 0 : i32
    %c0_i32_0 = arith.constant 0 : i32
    return %c0_i32, %arg1 : i32, i32
  }
  func.func @transform_3(%arg0: i32, %arg1: i32, %arg2: i32) -> (i32, i32) {
    %c0_i32 = arith.constant 0 : i32
    return %arg0, %arg1 : i32, i32
  }
}

</mosaic_0001>

<bundles_post_ra>
// kernel: fused_matmul.1
= control target key start
LH: loop header
LB: loop body
LE: loop exit
PB: predicated region body
PF: predicated region fallthrough
CT: control target
= control target key end

     0   :  { %s939_s1 = inlined_call_operand.vmem [shape: bf16[256,128], index: 1, kind: input, shape index: {}]   ;;  %s940_s0 = inlined_call_operand.vmem [shape: bf16[128,256], index: 0, kind: input, shape index: {}]   ;;  %s941_s2 = inlined_call_operand.vmem [shape: f32[1,128], index: 2, kind: input, shape index: {}]   ;;  %s942_s3 = inlined_call_operand.vmem [shape: bf16[128,128], index: 3, kind: output, shape index: {}]  }
   0x1   :  { %v738_v0 = vld [vmem:[%s939_s1 + $0x40] sm:$0xff]   ;;  %v740_v2 = vld [vmem:[%s939_s1 + $0x48] sm:$0xff]   ;;  %v742_v4 = vld [vmem:[%s939_s1 + $0x50] sm:$0xff]  }
   0x2   :  { %v739_v1 = vld [vmem:[%s939_s1] sm:$0xff]   ;;  %658 = vmatprep.subr.bf16.mxu0 %v738_v0  ;;  %722 = vmatprep.subr.bf16.mxu1 %v738_v0  ;;  %v741_v3 = vld [vmem:[%s939_s1 + $0x8] sm:$0xff]   ;;  %v743_v5 = vld [vmem:[%s939_s1 + $0x10] sm:$0xff]  }
   0x3   :  { %659 = vmatpush3.bf16.msra.mxu0 %v739_v1  ;;  %730 = vmatpush3.bf16.msra.mxu1 %v739_v1  ;;  %v744_v6 = vld [vmem:[%s939_s1 + $0x58] sm:$0xff]   ;;  %v746_v8 = vld [vmem:[%s939_s1 + $0x60] sm:$0xff]   ;;  %v748_v10 = vld [vmem:[%s939_s1 + $0x68] sm:$0xff]  }
   0x4   :  { %660 = vmatprep.subr.bf16.mxu0 %v740_v2  ;;  %723 = vmatprep.subr.bf16.mxu1 %v740_v2  ;;  %v745_v7 = vld [vmem:[%s939_s1 + $0x18] sm:$0xff]   ;;  %v747_v9 = vld [vmem:[%s939_s1 + $0x20] sm:$0xff]   ;;  %v749_v13 = vld [vmem:[%s939_s1 + $0x28] sm:$0xff]  }
   0x5   :  { %v756_v11 = vld [vmem:[%s940_s0 + $0x4] ss:$8 sps:$4 sm:$0xff]   ;;  %v750_v14 = vld [vmem:[%s939_s1 + $0x70] sm:$0xff]   ;;  %v752_v16 = vld [vmem:[%s939_s1 + $0x78] sm:$0xff]  }
   0x6   :  { %v759_v12 = vld [vmem:[%s940_s0 + $0x44] ss:$8 sps:$4 sm:$0xff]   ;;  %307 = vmatprep.mubr.bf16.mxu0 %v756_v11  ;;  %v751_v15 = vld [vmem:[%s939_s1 + $0x30] sm:$0xff]   ;;  %v753_v17 = vld [vmem:[%s939_s1 + $0x38] sm:$0xff]  }
   0x7   :  { %661 = vmatpush3.bf16.msra.mxu0 %v741_v3  ;;  %731 = vmatpush3.bf16.msra.mxu1 %v741_v3  ;;  %v754_v18 = vld [vmem:[%s940_s0] ss:$8 sps:$4 sm:$0xff]   ;;  %v760_v20 = vld [vmem:[%s940_s0 + $0x14] ss:$8 sps:$4 sm:$0xff]   ;;  %v764_v22 = vld [vmem:[%s940_s0 + $0x10] ss:$8 sps:$4 sm:$0xff]  }
   0x8   :  { %662 = vmatprep.subr.bf16.mxu0 %v742_v4  ;;  %724 = vmatprep.subr.bf16.mxu1 %v742_v4  ;;  %v757_v19 = vld [vmem:[%s940_s0 + $0x40] ss:$8 sps:$4 sm:$0xff]   ;;  %v762_v21 = vld [vmem:[%s940_s0 + $0x54] ss:$8 sps:$4 sm:$0xff]   ;;  %v765_v23 = vld [vmem:[%s940_s0 + $0x50] ss:$8 sps:$4 sm:$0xff]  }
   0x9   :  { %339 = vmatprep.mubr.bf16.mxu1 %v759_v12  ;;  %v766_v24 = vld [vmem:[%s940_s0 + $0x24] ss:$8 sps:$4 sm:$0xff]   ;;  %v770_v26 = vld [vmem:[%s940_s0 + $0x20] ss:$8 sps:$4 sm:$0xff]   ;;  %v772_v28 = vld [vmem:[%s940_s0 + $0x34] ss:$8 sps:$4 sm:$0xff]  }
   0xa   :  { %v768_v25 = vld [vmem:[%s940_s0 + $0x64] ss:$8 sps:$4 sm:$0xff]   ;;  %v771_v27 = vld [vmem:[%s940_s0 + $0x60] ss:$8 sps:$4 sm:$0xff]   ;;  %v774_v29 = vld [vmem:[%s940_s0 + $0x74] ss:$8 sps:$4 sm:$0xff]  }
   0xb   :  { %663 = vmatpush3.bf16.msra.mxu0 %v743_v5  ;;  %732 = vmatpush3.bf16.msra.mxu1 %v743_v5  ;;  %v776_v30 = vld [vmem:[%s940_s0 + $0x30] ss:$8 sps:$4 sm:$0xff]   ;;  %v897_v35 = vld [vmem:[%s941_s2] ss:$0 sm:$0xff] }
   0xc   :  { %664 = vmatprep.subr.bf16.mxu0 %v744_v6  ;;  %725 = vmatprep.subr.bf16.mxu1 %v744_v6  ;;  %v777_v31 = vld [vmem:[%s940_s0 + $0x70] ss:$8 sps:$4 sm:$0xff]  }
   0xf   :  { %665 = vmatpush3.bf16.msra.mxu0 %v745_v7  ;;  %733 = vmatpush3.bf16.msra.mxu1 %v745_v7 }
  0x10   :  { %666 = vmatprep.subr.bf16.mxu0 %v746_v8  ;;  %726 = vmatprep.subr.bf16.mxu1 %v746_v8 }
  0x13   :  { %667 = vmatpush3.bf16.msra.mxu0 %v747_v9  ;;  %734 = vmatpush3.bf16.msra.mxu1 %v747_v9 }
  0x14   :  { %668 = vmatprep.subr.bf16.mxu0 %v748_v10  ;;  %727 = vmatprep.subr.bf16.mxu1 %v748_v10 }
  0x17   :  { %669 = vmatpush3.bf16.msra.mxu0 %v749_v13  ;;  %735 = vmatpush3.bf16.msra.mxu1 %v749_v13 }
  0x18   :  { %670 = vmatprep.subr.bf16.mxu0 %v750_v14  ;;  %728 = vmatprep.subr.bf16.mxu1 %v750_v14 }
  0x1b   :  { %671 = vmatpush3.bf16.msra.mxu0 %v751_v15  ;;  %736 = vmatpush3.bf16.msra.mxu1 %v751_v15 }
  0x1c   :  { %672 = vmatprep.subr.bf16.mxu0 %v752_v16  ;;  %729 = vmatprep.subr.bf16.mxu1 %v752_v16 }
  0x1f   :  { %673 = vmatpush3.bf16.msra.mxu0 %v753_v17  ;;  %737 = vmatpush3.bf16.msra.mxu1 %v753_v17 }
  0x22   :  { %308 = vmatmul.mubr.bf16.vlgmr.msra.gmra.mrb[0].mxu0 %v754_v18  ;;  %340 = vmatmul.mubr.bf16.vlgmr.msra.gmra.mrb[0].mxu1 %v757_v19 }
  0x23   :  { %315 = vmatprep.mubr.bf16.mxu0 %v760_v20  ;;  %347 = vmatprep.mubr.bf16.mxu1 %v762_v21 }
  0x2a   :  { %316 = vmatmul.mubr.bf16.gmra.mrb[4].mxu0 %v764_v22  ;;  %348 = vmatmul.mubr.bf16.gmra.mrb[4].mxu1 %v765_v23 }
  0x2b   :  { %323 = vmatprep.mubr.bf16.mxu0 %v766_v24  ;;  %355 = vmatprep.mubr.bf16.mxu1 %v768_v25 }
  0x32   :  { %324 = vmatmul.mubr.bf16.gmra.mrb[8].mxu0 %v770_v26  ;;  %356 = vmatmul.mubr.bf16.gmra.mrb[8].mxu1 %v771_v27 }
  0x33   :  { %331 = vmatprep.mubr.bf16.mxu0 %v772_v28  ;;  %363 = vmatprep.mubr.bf16.mxu1 %v774_v29 }
  0x3a   :  { %332 = vmatmul.mubr.bf16.gmra.mrb[12].mxu0 %v776_v30  ;;  %364 = vmatmul.mubr.bf16.gmra.mrb[12].mxu1 %v777_v31 }
  0xf5   :  { %v674_v32 = vpop.f32.mrb[0].mxu0  ;;  %v698_v33 = vpop.f32.mrb[0].mxu1 }
  0xf6   :  { %v675_v34 = vpop.f32.mrb[1].mxu0  ;;  %v699_v36 = vpop.f32.mrb[1].mxu1 }
  0xf7   :  { %v676_v37 = vadd.f32 %v675_v34, %v674_v32  ;;  %v700_v38 = vadd.f32 %v699_v36, %v698_v33  ;;  %v677_v39 = vpop.f32.mrb[2].mxu0  ;;  %v701_v40 = vpop.f32.mrb[2].mxu1 }
  0xf8   :  { %v678_v41 = vpop.f32.mrb[3].mxu0  ;;  %v702_v42 = vpop.f32.mrb[3].mxu1 }
  0xf9   :  { %v430_v43 = vadd.f32 %v676_v37, %v897_v35  ;;  %v438_v44 = vadd.f32 %v700_v38, %v897_v35  ;;  %v679_v45 = vadd.f32 %v678_v41, %v677_v39  ;;  %v703_v46 = vadd.f32 %v702_v42, %v701_v40 }
  0xfb   :  { %v431_v47 = vadd.f32 %v679_v45, %v897_v35  ;;  %v439_v48 = vadd.f32 %v703_v46, %v897_v35  ;;  %v446_v49 = vmax.f32 %v430_v43, 0.0  ;;  %v454_v50 = vmax.f32 %v438_v44, 0.0 }
  0xfd   :  { %v447_v51 = vmax.f32 %v431_v47, 0.0  ;;  %v455_v52 = vmax.f32 %v439_v48, 0.0  ;;  %v680_v53 = vpop.f32.mrb[4].mxu0  ;;  %v704_v54 = vpop.f32.mrb[4].mxu1 }
  0xfe   :  { %v681_v55 = vpop.f32.mrb[5].mxu0  ;;  %v705_v56 = vpop.f32.mrb[5].mxu1 }
  0xff   :  { %v614_v57 = vpack.c.bf16 %v447_v51, %v446_v49  ;;  %v634_v58 = vpack.c.bf16 %v455_v52, %v454_v50  ;;  %v682_v59 = vadd.f32 %v681_v55, %v680_v53  ;;  %v706_v60 = vadd.f32 %v705_v56, %v704_v54  ;;  %v683_v61 = vpop.f32.mrb[6].mxu0  ;;  %v707_v62 = vpop.f32.mrb[6].mxu1 }
 0x100   :  { %v684_v63 = vpop.f32.mrb[7].mxu0  ;;  %v708_v0 = vpop.f32.mrb[7].mxu1 }
 0x101   :  { %615 = vst [vmem:[%s942_s3] sm:$0xff] %v614_v57   ;;  %654 = vst [vmem:[%s942_s3 + $0x20] sm:$0xff] %v634_v58   ;;  %v432_v1 = vadd.f32 %v682_v59, %v897_v35  ;;  %v440_v2 = vadd.f32 %v706_v60, %v897_v35  ;;  %v685_v3 = vadd.f32 %v684_v63, %v683_v61 }
 0x102   :  { %v709_v4 = vadd.f32 %v708_v0, %v707_v62 }
 0x103   :  { %v433_v5 = vadd.f32 %v685_v3, %v897_v35  ;;  %v448_v7 = vmax.f32 %v432_v1, 0.0  ;;  %v456_v8 = vmax.f32 %v440_v2, 0.0 }
 0x104   :  { %v441_v6 = vadd.f32 %v709_v4, %v897_v35 }
 0x105   :  { %v449_v9 = vmax.f32 %v433_v5, 0.0  ;;  %v686_v11 = vpop.f32.mrb[8].mxu0  ;;  %v710_v12 = vpop.f32.mrb[8].mxu1 }
 0x106   :  { %v457_v10 = vmax.f32 %v441_v6, 0.0  ;;  %v687_v13 = vpop.f32.mrb[9].mxu0  ;;  %v711_v14 = vpop.f32.mrb[9].mxu1 }
 0x107   :  { %v619_v15 = vpack.c.bf16 %v449_v9, %v448_v7  ;;  %v688_v17 = vadd.f32 %v687_v13, %v686_v11  ;;  %v712_v18 = vadd.f32 %v711_v14, %v710_v12  ;;  %v689_v19 = vpop.f32.mrb[10].mxu0  ;;  %v713_v20 = vpop.f32.mrb[10].mxu1 }
 0x108   :  { %v639_v16 = vpack.c.bf16 %v457_v10, %v456_v8  ;;  %v690_v21 = vpop.f32.mrb[11].mxu0  ;;  %v714_v22 = vpop.f32.mrb[11].mxu1 }
 0x109   :  { %651 = vst [vmem:[%s942_s3 + $0x8] sm:$0xff] %v619_v15   ;;  %v434_v23 = vadd.f32 %v688_v17, %v897_v35  ;;  %v442_v24 = vadd.f32 %v712_v18, %v897_v35  ;;  %v691_v25 = vadd.f32 %v690_v21, %v689_v19  ;;  %v715_v26 = vadd.f32 %v714_v22, %v713_v20 }
 0x10a   :  { %655 = vst [vmem:[%s942_s3 + $0x28] sm:$0xff] %v639_v16  }
 0x10b   :  { %v435_v27 = vadd.f32 %v691_v25, %v897_v35  ;;  %v443_v28 = vadd.f32 %v715_v26, %v897_v35  ;;  %v450_v29 = vmax.f32 %v434_v23, 0.0  ;;  %v458_v30 = vmax.f32 %v442_v24, 0.0 }
 0x10d   :  { %v451_v31 = vmax.f32 %v435_v27, 0.0  ;;  %v459_v32 = vmax.f32 %v443_v28, 0.0  ;;  %v692_v33 = vpop.f32.mrb[12].mxu0  ;;  %v716_v34 = vpop.f32.mrb[12].mxu1 }
 0x10e   :  { %v693_v36 = vpop.f32.mrb[13].mxu0  ;;  %v717_v37 = vpop.f32.mrb[13].mxu1 }
 0x10f   :  { %v624_v38 = vpack.c.bf16 %v451_v31, %v450_v29  ;;  %v644_v39 = vpack.c.bf16 %v459_v32, %v458_v30  ;;  %v694_v40 = vadd.f32 %v693_v36, %v692_v33  ;;  %v718_v41 = vadd.f32 %v717_v37, %v716_v34  ;;  %v695_v42 = vpop.f32.mrb[14].mxu0  ;;  %v719_v43 = vpop.f32.mrb[14].mxu1 }
 0x110   :  { %v696_v44 = vpop.f32.mrb[15].mxu0  ;;  %v720_v45 = vpop.f32.mrb[15].mxu1 }
 0x111   :  { %652 = vst [vmem:[%s942_s3 + $0x10] sm:$0xff] %v624_v38   ;;  %656 = vst [vmem:[%s942_s3 + $0x30] sm:$0xff] %v644_v39   ;;  %v436_v46 = vadd.f32 %v694_v40, %v897_v35  ;;  %v444_v47 = vadd.f32 %v718_v41, %v897_v35  ;;  %v697_v48 = vadd.f32 %v696_v44, %v695_v42 }
 0x112   :  { %v721_v49 = vadd.f32 %v720_v45, %v719_v43 }
 0x113   :  { %v437_v50 = vadd.f32 %v697_v48, %v897_v35  ;;  %v452_v52 = vmax.f32 %v436_v46, 0.0  ;;  %v460_v53 = vmax.f32 %v444_v47, 0.0 }
 0x114   :  { %v445_v51 = vadd.f32 %v721_v49, %v897_v35 }
 0x115   :  { %v453_v54 = vmax.f32 %v437_v50, 0.0 }
 0x116   :  { %v461_v55 = vmax.f32 %v445_v51, 0.0 }
 0x117   :  { %v629_v56 = vpack.c.bf16 %v453_v54, %v452_v52 }
 0x118   :  { %v649_v57 = vpack.c.bf16 %v461_v55, %v460_v53 }
 0x119   :  { %653 = vst [vmem:[%s942_s3 + $0x18] sm:$0xff] %v629_v56  }
 0x11a   :  { %657 = vst [vmem:[%s942_s3 + $0x38] sm:$0xff] %v649_v57  }

</bundles_post_ra>
